<compile_context>
chip_gen: v7x
topology: tpu7x:2x2x1
jax: 0.10.0
libtpu: 0.0.40
codegen_flags: <defaults>
</compile_context>

<pallas_src>
import functools
import math
import random

import jax
import jax.numpy as jnp
from jax.experimental import pallas as pl
from jax.experimental.pallas import tpu as pltpu


# ------------------------------------------------------------------ device-side weight builders
def _interp_weights(out_size: int, in_size: int, factor):
    """Indices/weights of F.interpolate(mode='bilinear', align_corners=False). factor is traced."""
    # TODO(synk): matches the 'use provided scale_factor' path; recompute_scale_factor=True
    # configurations differ slightly at boundary pixels.
    dst = jnp.arange(out_size, dtype=jnp.float32)
    src = jnp.maximum((dst + 0.5) / factor - 0.5, 0.0)          # clamp source coord to >= 0
    i0f = jnp.clip(jnp.floor(src), 0.0, float(in_size - 1))
    i0 = i0f.astype(jnp.int32)
    i1 = jnp.minimum(i0 + 1, in_size - 1)
    w1 = jnp.clip(src - i0f, 0.0, 1.0)
    w0 = 1.0 - w1
    return i0, i1, w0, w1


def _interp_matrix(out_size: int, in_size: int, factor):
    """(out_size, in_size) row-stochastic bilinear matrix, built on device (f32)."""
    i0, i1, w0, w1 = _interp_weights(out_size, in_size, factor)
    cols = jnp.arange(in_size, dtype=jnp.int32)[None, :]
    return ((cols == i0[:, None]).astype(jnp.float32) * w0[:, None]
            + (cols == i1[:, None]).astype(jnp.float32) * w1[:, None])


def _interp_matrix_T(out_size: int, in_size: int, factor, out_total: int):
    """(in_size, out_total) transposed bilinear matrix; columns >= out_size are zero padding
    (keeps the kernel's output lane width 128-aligned at zero extra in-kernel cost)."""
    i0, i1, w0, w1 = _interp_weights(out_size, in_size, factor)
    rows = jnp.arange(in_size, dtype=jnp.int32)[:, None]
    mat = ((rows == i0[None, :]).astype(jnp.float32) * w0[None, :]
           + (rows == i1[None, :]).astype(jnp.float32) * w1[None, :])
    if out_total > out_size:
        mat = jnp.pad(mat, ((0, 0), (0, out_total - out_size)))
    return mat


# ------------------------------------------------------------------ kernel
def _make_resize_kernel(bc: int, h: int, w: int, h_out: int, tw: int, flat_width: bool):
    def kernel(wy_ref, wxt_ref, x_ref, o_ref):
        wy = wy_ref[...]      # (h_out, h)  f32, resident
        wxt = wxt_ref[...]    # (w, tw)     f32
        if flat_width:
            # Width pass as ONE flattened MXU matmul: (bc*h, w) @ (w, tw).
            # Reshape is free because h % 8 == 0 (sublane-aligned collapse).
            x = x_ref[...].astype(jnp.float32)                        # (bc, h, w)
            t = jnp.dot(x.reshape(bc * h, w), wxt,
                        preferred_element_type=jnp.float32)           # (bc*h, tw)
            t = t.reshape(bc, h, tw)
            for b in range(bc):                                       # height pass per plane
                o_ref[b, :, :] = jnp.dot(
                    wy, t[b], preferred_element_type=jnp.float32).astype(o_ref.dtype)
        else:
            # Rare fallback (input H not 8-aligned): per-plane 2-D dots, no reshapes.
            for b in range(bc):
                xb = x_ref[b, :, :].astype(jnp.float32)               # (h, w)
                tb = jnp.dot(xb, wxt, preferred_element_type=jnp.float32)
                o_ref[b, :, :] = jnp.dot(
                    wy, tb, preferred_element_type=jnp.float32).astype(o_ref.dtype)

    return kernel


# ------------------------------------------------------------------ planning
def _plan(nc, h, w, h_out, w_out, itemsize):
    BC_MAX = 32               # static unroll bound for the per-plane height pass
    BLOCK_BYTES = 2 << 20     # ~2 MiB per-step input block: pipelining sweet spot (mem-bound op)
    BUDGET = 20 << 20         # conservative per-step VMEM accounting budget (v7x-safe)

    plane = h * w * itemsize
    bc = max(1, min(BLOCK_BYTES // max(plane, 1), BC_MAX, nc))
    if nc >= 4:
        bc = max(1, min(bc, nc // 4))   # guarantee >= 4 NC grid steps (overlap + megacore)
    else:
        bc = 1

    w128 = -(-w_out // 128)
    w_p128 = 128 * w128
    lane_pad_ok = (w_p128 - w_out) * 4 <= w_out      # <= 25% extra output columns

    def w_split(ntiles):
        ntiles = max(1, min(ntiles, w128))
        if ntiles <= 1:
            tot = w_p128 if lane_pad_ok else w_out
            return 1, tot, tot
        groups = -(-w128 // ntiles)
        tw_ = 128 * groups
        tiles = -(-w128 // groups)
        return tiles, tw_, tiles * tw_

    def pad_ok(total):
        return (total - w_out) * 4 <= w_out

    nc_steps = -(-nc // bc)
    w_tiles, tw, w_total = w_split(1)

    # Second "parallel" grid axis over 128-aligned output-column tiles when the NC axis alone
    # gives < 4 steps (tiny NC: keeps both v7x TCs busy and the pipeline deep).
    if nc_steps < 4 and lane_pad_ok and w128 >= 2:
        want = -(-4 // nc_steps)
        for cand in list(range(want, w128 + 1)) + list(range(want - 1, 1, -1)):
            tiles, tw_, tot = w_split(cand)
            if tiles >= 2 and pad_ok(tot):
                w_tiles, tw, w_total = tiles, tw_, tot
                break

    def vmem_bytes(bc_, tw_):
        in_blk = bc_ * h * w * itemsize
        out_blk = bc_ * h_out * tw_ * itemsize
        wy_b = h_out * h * 4
        wxt_b = w * tw_ * 4
        f32_tmp = bc_ * h * w * 4 + bc_ * h * tw_ * 4 + h_out * tw_ * 4
        return 2 * (in_blk + out_blk + wy_b + wxt_b) + f32_tmp

    # VMEM backstop: shrink bc first, then fall back to the finest (128-wide) column tiles.
    while bc > 1 and vmem_bytes(bc, tw) > BUDGET:
        bc = max(1, bc // 2)
    if vmem_bytes(bc, tw) > BUDGET and lane_pad_ok and w128 >= 2:
        tiles, tw_, tot = w_split(w128)
        if tiles >= 2:
            w_tiles, tw, w_total = tiles, tw_, tot

    nc_steps = -(-nc // bc)
    nc_pad = nc_steps * bc
    flat_width = (h % 8 == 0)
    return bc, nc_steps, nc_pad, w_tiles, tw, w_total, flat_width


# ------------------------------------------------------------------ cached builder
@functools.lru_cache(maxsize=128)
def _build_resize_fn(n, c, h, w, h_out, w_out, dtype_name):
    dtype = jnp.dtype(dtype_name)
    itemsize = dtype.itemsize
    nc = n * c
    bc, nc_steps, nc_pad, w_tiles, tw, w_total, flat_width = _plan(
        nc, h, w, h_out, w_out, itemsize)

    kernel = _make_resize_kernel(bc, h, w, h_out, tw, flat_width)

    flops = 2 * nc * (h * w * w_total + h * h_out * w_total)
    bytes_accessed = (nc * h * w + nc_pad * h_out * w_total) * itemsize \
        + (h_out * h + w * w_total) * 4
    cost = pl.CostEstimate(flops=flops, transcendentals=0, bytes_accessed=bytes_accessed)

    call = pl.pallas_call(
        kernel,
        out_shape=jax.ShapeDtypeStruct((nc_pad, h_out, w_total), dtype),
        grid=(nc_steps, w_tiles),
        in_specs=[
            pl.BlockSpec((h_out, h), lambda i, j: (0, 0)),      # Wy: resident every step
            pl.BlockSpec((w, tw), lambda i, j: (0, j)),         # Wx^T column tile
            pl.BlockSpec((bc, h, w), lambda i, j: (i, 0, 0)),   # bc planes; refetch elided over j
        ],
        out_specs=pl.BlockSpec((bc, h_out, tw), lambda i, j: (i, 0, j)),
        compiler_params=pltpu.CompilerParams(
            dimension_semantics=("parallel", "parallel"),
            vmem_limit_bytes=40 * 1024 * 1024,   # well under v7x's 64 MiB physical
        ),
        cost_estimate=cost,
    )

    def run(x, hf, wf):
        # Weights built on device from the two (traced) scalar factors: no host matrix build /
        # H2D per call, one executable per output shape. f32 weights even for bf16 images.
        wy = _interp_matrix(h_out, h, hf)                    # (h_out, h)
        wxt = _interp_matrix_T(w_out, w, wf, w_total)        # (w, w_total), zero pad columns
        xf = x.reshape(nc, h, w)
        if nc_pad != nc:
            xf = jnp.pad(xf, ((0, nc_pad - nc), (0, 0), (0, 0)))
        out = call(wy, wxt, xf)
        out = out[:nc, :, :w_out]
        return out.reshape(n, c, h_out, w_out)

    return jax.jit(run)


# ------------------------------------------------------------------ wrapper
def bilinear_resize_nchw(x: jnp.ndarray, height_factor: float, width_factor: float) -> jnp.ndarray:
    N, C, H, W = x.shape
    H_out = max(1, int(math.floor(H * height_factor)))   # guard against 0-sized outputs
    W_out = max(1, int(math.floor(W * width_factor)))
    fn = _build_resize_fn(N, C, H, W, H_out, W_out, jnp.dtype(x.dtype).name)
    return fn(x, jnp.float32(height_factor), jnp.float32(width_factor))


class RandomResize:
    """JAX/Pallas port of torch_dreams random_resize."""

    def __init__(self, max_size_factor: float, min_size_factor: float, seed: int = 0):
        self.max_size_factor = max_size_factor
        self.min_size_factor = min_size_factor
        # TODO(synk): original module uses the global Python `random` RNG; output shapes must be
        # static in JAX, so factors are drawn host-side from a seeded RNG at trace time.
        self._rng = random.Random(seed)

    def __call__(self, x: jnp.ndarray) -> jnp.ndarray:
        height_factor = self._rng.uniform(self.min_size_factor, self.max_size_factor)
        width_factor = self._rng.uniform(self.min_size_factor, self.max_size_factor)
        return bilinear_resize_nchw(x, height_factor, width_factor)


if __name__ == "__main__":
    key = jax.random.PRNGKey(0)
    x = jax.random.normal(key, (2, 4, 16, 16), dtype=jnp.float32)

    module = RandomResize(max_size_factor=1.2, min_size_factor=0.8, seed=0)
    y = jax.block_until_ready(module(x))
    assert y.ndim == 4 and y.shape[:2] == (2, 4), f"bad output shape {y.shape}"
    assert jnp.all(jnp.isfinite(y)), "non-finite output"

    # Correctness check against a plain-JAX reference of the same separable bilinear math.
    hf, wf = 1.15, 0.85
    y2 = jax.block_until_ready(bilinear_resize_nchw(x, hf, wf))
    H_out = int(math.floor(16 * hf))
    W_out = int(math.floor(16 * wf))
    wy_ref = _interp_matrix(H_out, 16, jnp.float32(hf))               # (H_out, 16)
    wxt_ref = _interp_matrix_T(W_out, 16, jnp.float32(wf), W_out)     # (16, W_out)
    ref = jnp.einsum("oh,nchw,wx->ncox", wy_ref, x, wxt_ref,
                     precision=jax.lax.Precision.HIGHEST)
    assert y2.shape == ref.shape, f"shape mismatch {y2.shape} vs {ref.shape}"
    assert jnp.allclose(y2, ref, atol=1e-2, rtol=1e-2), "mismatch vs plain-JAX reference"

    # bf16 path sanity (f32 weights + f32 MXU accumulation, bf16 store).
    y3 = jax.block_until_ready(bilinear_resize_nchw(x.astype(jnp.bfloat16), 1.1, 0.9))
    assert y3.dtype == jnp.bfloat16 and y3.shape == (2, 4, 17, 14), f"bad bf16 output {y3.shape}"
    assert jnp.all(jnp.isfinite(y3.astype(jnp.float32))), "non-finite bf16 output"

    print("KERNEL_OK")
</pallas_src>

<mosaic_0001>
module attributes {stable_mosaic.version = 11 : i64} {
  func.func @kernel(%arg0: i32, %arg1: i32, %arg2: memref<18x16xf32, #tpu.memory_space<vmem>>, %arg3: memref<16x17xf32, #tpu.memory_space<vmem>>, %arg4: memref<2x16x16xf32, #tpu.memory_space<vmem>>, %arg5: memref<2x18x17xf32, #tpu.memory_space<vmem>>) attributes {dimension_semantics = [#tpu.dimension_semantics<parallel>, #tpu.dimension_semantics<parallel>], iteration_bounds = array<i64: 4, 1>, scalar_prefetch = 0 : i64, scratch_operands = 0 : i64, tpu.core_type = #tpu.core_type<tc>, window_params = [{pipeline_mode = #tpu.pipeline_mode<synchronous>, transform_indices = @transform_0, window_bounds = array<i64: 18, 16>}, {transform_indices = @transform_1, window_bounds = array<i64: 16, 17>}, {transform_indices = @transform_2, window_bounds = array<i64: 2, 16, 16>}, {transform_indices = @transform_3, window_bounds = array<i64: 2, 18, 17>}]} {
    %c0 = arith.constant 0 : index
    %c0_0 = arith.constant 0 : index
    %0 = vector.load %arg2[%c0, %c0_0] : memref<18x16xf32, #tpu.memory_space<vmem>>, vector<18x16xf32>
    %c0_1 = arith.constant 0 : index
    %c0_2 = arith.constant 0 : index
    %1 = vector.load %arg3[%c0_1, %c0_2] : memref<16x17xf32, #tpu.memory_space<vmem>>, vector<16x17xf32>
    %c0_3 = arith.constant 0 : index
    %c0_4 = arith.constant 0 : index
    %c0_5 = arith.constant 0 : index
    %2 = vector.load %arg4[%c0_3, %c0_4, %c0_5] : memref<2x16x16xf32, #tpu.memory_space<vmem>>, vector<2x16x16xf32>
    %3 = vector.shape_cast %2 : vector<2x16x16xf32> to vector<32x16xf32>
    %cst = arith.constant dense<0.000000e+00> : vector<32x17xf32>
    %4 = tpu.matmul %3, %1, %cst {dimension_numbers = #tpu.dot_dimension_numbers<[1], [0], [0], [1], [0, 0, 1, 1], [], []>} : vector<32x16xf32>, vector<16x17xf32>, vector<32x17xf32> -> vector<32x17xf32>
    %5 = vector.shape_cast %4 : vector<32x17xf32> to vector<2x16x17xf32>
    %6 = vector.extract_strided_slice %5 {offsets = [0, 0, 0], sizes = [1, 16, 17], strides = [1, 1, 1]} : vector<2x16x17xf32> to vector<1x16x17xf32>
    %7 = vector.shape_cast %6 : vector<1x16x17xf32> to vector<16x17xf32>
    %cst_6 = arith.constant dense<0.000000e+00> : vector<18x17xf32>
    %8 = tpu.matmul %0, %7, %cst_6 {dimension_numbers = #tpu.dot_dimension_numbers<[1], [0], [0], [1], [0, 0, 1, 1], [], []>} : vector<18x16xf32>, vector<16x17xf32>, vector<18x17xf32> -> vector<18x17xf32>
    %c0_7 = arith.constant 0 : index
    %c0_8 = arith.constant 0 : index
    %c0_9 = arith.constant 0 : index
    %9 = vector.load %arg5[%c0_7, %c0_8, %c0_9] : memref<2x18x17xf32, #tpu.memory_space<vmem>>, vector<1x18x17xf32>
    %10 = vector.shape_cast %9 : vector<1x18x17xf32> to vector<18x17xf32>
    %11 = vector.shape_cast %8 : vector<18x17xf32> to vector<1x18x17xf32>
    tpu.vector_store %arg5[%c0_7, %c0_8, %c0_9], %11 {strides = array<i32>} : memref<2x18x17xf32, #tpu.memory_space<vmem>>, vector<1x18x17xf32>,
    %12 = vector.extract_strided_slice %5 {offsets = [1, 0, 0], sizes = [1, 16, 17], strides = [1, 1, 1]} : vector<2x16x17xf32> to vector<1x16x17xf32>
    %13 = vector.shape_cast %12 : vector<1x16x17xf32> to vector<16x17xf32>
    %cst_10 = arith.constant dense<0.000000e+00> : vector<18x17xf32>
    %14 = tpu.matmul %0, %13, %cst_10 {dimension_numbers = #tpu.dot_dimension_numbers<[1], [0], [0], [1], [0, 0, 1, 1], [], []>} : vector<18x16xf32>, vector<16x17xf32>, vector<18x17xf32> -> vector<18x17xf32>
    %c1 = arith.constant 1 : index
    %c0_11 = arith.constant 0 : index
    %c0_12 = arith.constant 0 : index
    %15 = vector.load %arg5[%c1, %c0_11, %c0_12] : memref<2x18x17xf32, #tpu.memory_space<vmem>>, vector<1x18x17xf32>
    %16 = vector.shape_cast %15 : vector<1x18x17xf32> to vector<18x17xf32>
    %17 = vector.shape_cast %14 : vector<18x17xf32> to vector<1x18x17xf32>
    tpu.vector_store %arg5[%c1, %c0_11, %c0_12], %17 {strides = array<i32>} : memref<2x18x17xf32, #tpu.memory_space<vmem>>, vector<1x18x17xf32>,
    return
  }
  func.func @transform_0(%arg0: i32, %arg1: i32) -> (i32, i32) {
    %c0_i32 = arith.constant 0 : i32
    %c0_i32_0 = arith.constant 0 : i32
    %c0_i32_1 = arith.constant 0 : i32
    return %c0_i32, %c0_i32_0 : i32, i32
  }
  func.func @transform_1(%arg0: i32, %arg1: i32) -> (i32, i32) {
    %c0_i32 = arith.constant 0 : i32
    %c0_i32_0 = arith.constant 0 : i32
    return %c0_i32, %arg1 : i32, i32
  }
  func.func @transform_2(%arg0: i32, %arg1: i32) -> (i32, i32, i32) {
    %c0_i32 = arith.constant 0 : i32
    %c0_i32_0 = arith.constant 0 : i32
    %c0_i32_1 = arith.constant 0 : i32
    return %arg0, %c0_i32, %c0_i32_0 : i32, i32, i32
  }
  func.func @transform_3(%arg0: i32, %arg1: i32) -> (i32, i32, i32) {
    %c0_i32 = arith.constant 0 : i32
    %c0_i32_0 = arith.constant 0 : i32
    return %arg0, %c0_i32, %arg1 : i32, i32, i32
  }
}

</mosaic_0001>

<bundles_post_ra>
// kernel: run.1
= control target key start
LH: loop header
LB: loop body
LE: loop exit
PB: predicated region body
PF: predicated region fallthrough
CT: control target
= control target key end

     0   :  { %8 = vsyncpa [#allocation3], 0  ;;  %s1042_s0 = inlined_call_operand.vmem [shape: f32[18,16], index: 0, kind: input, shape index: {}]   ;;  %s1043_s1 = inlined_call_operand.vmem [shape: f32[16,17], index: 1, kind: input, shape index: {}]   ;;  %s1044_s2 = inlined_call_operand.hbm [shape: f32[8,16,16], index: 2, kind: input, shape index: {}]   ;;  %s1045_s3 = inlined_call_operand.vmem [shape: f32[8,18,17], index: 3, kind: output, shape index: {}]  }
   0x1   :  { %10 = vsyncpa [#allocation3 + $0x1], 0  ;;  %s888_s12 = smov 0   ;;  %s890_s13 = smov 0  }
   0x2   :  { %s892_s14 = smov 0   ;;  %s894_s15 = smov 0  }
   0x3   :  { %s896_s16 = smov 0   ;;  %s898_s17 = smov 0  }
   0x4 LB: > { %s625_s18 = sadd.s32 4294967295, %s860_s17   ;;  %s28_s19 = sadd.s32 1, %s856_s16  ;;  %s860_s17 = sphi %s898_s17, %s16_s17   ;;  %s856_s16 = sphi %s896_s16, %s1053_s16   ;;  %s852_s15 = sphi %s894_s15, %s1052_s15   ;;  %s848_s14 = sphi %s892_s14, %s1051_s14   ;;  %s844_s13 = sphi %s890_s13, %s1050_s13   ;;  %s840_s12 = sphi %s888_s12, %s1049_s12  }
   0x5   : > { %p30_p0 = scmp.ge.s32.totalorder %s28_s19, 4  ;;  %s82_s20 = sadd.s32 1, %s848_s14 }
   0x6   : > { %p89_p1 = scmp.ne.s32.totalorder %s848_s14, %s844_s13  ;;  %p90_p2 = scmp.eq.s32.totalorder %s860_s17, 0 }
   0x7   : > { %s1055_s19 = smov (%p30_p0, %s28_s19), 0  ;;  %p95_p4 = scmp.ne.s32.totalorder %s844_s13, %s840_s12 }
   0x8   : > { %p924_p3 = por %p90_p2, %p89_p1  ;;  %s79_s22 = ssub.s32 %s856_s16, %s1055_s19 }
   0x9   : > { %p96_p5 = scmp.eq.s32.totalorder %s625_s18, 0  ;;  %p80_p6 = scmp.eq.s32.totalorder %s79_s22, 0 }
   0xa   : > { %p726_p8 = scmp.lt.s32.totalorder %s860_s17, 4  ;;  %s157_s25 = sand.u32 1, %s848_s14  }
   0xb   : > { %p931_p7 = por %p96_p5, %p95_p4  ;;  %s654_s26 = sshll.u32 %s856_s16, 9 }
   0xc   : > { %s937_s24 = scalar_select %p80_p6, %s848_s14, %s82_s20  }
   0xd   : > { %s630_s27 = sshll.u32 %s157_s25, 5  ;;  %s944_s30 = scalar_lea.hbm %s1044_s2, %s654_s26 }
   0xe   : > { %s161_s4 = scalar_lea.vmem [#allocation2], %s630_s27  ;;  %p948_p9 = pnand %p726_p8, %p924_p3 }
   0xf   : > { %s169_s5 = sshll.u32 %s161_s4, 4  ;;  %s954_s7 = scalar_lea.sflag [#allocation3], %s157_s25  ;;  %s952_s5 = int_to_ptr.vmem [resolvable:$true] %s169_s5 }
  0x10   : > { %s780_s8 = scalar_lea.hbm %s944_s30, 512  ;;  %p782_p11 = pneg %p948_p9 }
  0x11   : > { %p781_p10 = scmp.ne.s32.totalorder %s944_s30, %s780_s8  ;;  %s785_s11 = scalar_lea.hbm %s1044_s2, 2048 }
  0x12   : > { %p786_p0 = scmp.lt.u32.totalorder %s944_s30, %s1044_s2  ;;  %p787_p1 = scmp.lt.u32.totalorder %s785_s11, %s780_s8 }
  0x13   : > { %p783_p12 = pnand %p782_p11, %p781_p10  ;;  %p789_p3 = scmp.lt.u32.totalorder %s780_s8, %s944_s30 }
  0x14   : > { %p788_p2 = por %p787_p1, %p786_p0 }
  0x15   : > { %p784_p13 = pneg %p783_p12 }
  0x16   : > { %p790_p4 = por %p789_p3, %p788_p2 }
  0x18   : > { %p791_p5 = pnand %p790_p4, %p784_p13 }
  0x1a   : > { %794 = shalt.err (!%p791_p5)
}
  0x1b   : > { %s795_s20 = scalar_lea.vmem %s952_s5, 512  ;;  %s862_s21 = smov [#allocation2]  }
  0x1c   : > { %p796_p6 = scmp.ne.s32.totalorder %s952_s5, %s795_s20  ;;  %s800_s22 = sshll.u32 %s862_s21, 4  ;;  %s801_s22 = int_to_ptr.vmem [resolvable:$false] %s800_s22 }
  0x1d   : > { %s802_s25 = scalar_lea.vmem %s801_s22, 1024  ;;  %p803_p12 = scmp.lt.s32.totalorder %s952_s5, %s801_s22 }
  0x1e   : > { %p798_p8 = pnand %p796_p6, %p782_p11  ;;  %p804_p0 = scmp.lt.s32.totalorder %s802_s25, %s795_s20 }
  0x20   : > { %p799_p10 = pneg %p798_p8  ;;  %p805_p1 = por %p804_p0, %p803_p12 }
  0x22   : > { %p806_p2 = pnand %p805_p1, %p799_p10 }
  0x24   : > { %809 = shalt.err (!%p806_p2)
}
  0x25   : > { %s863_s26 = smov 128   ;;  %s864_s27 = smov 8  }
  0x26   : > { %725 = dma.hbm_to_vmem [thread:$0]  (!%p948_p9), %s944_s30, 512, %s952_s5, %s954_s7, %s863_s26, %s863_s26, %s864_s27  }
  0x27   : > { %p634_p11 = scmp.ge.s32.totalorder %s860_s17, 1  ;;  %p177_p13 = scmp.lt.s32.totalorder %s860_s17, 5 }
  0x29   : > { %p178_p3 = pnand %p634_p11, %p177_p13 }
  0x2a   : > { %s183_s28 = sand.u32 (!%p178_p3), 1, %s844_s13  }
  0x2b   : > { %181 = sbr.rel (%p178_p3) target bundleno = 497 (0x1f1), region = 32  ;;  %s635_s29 = sshll.u32 (!%p178_p3), %s183_s28, 5 }
  0x2c   : > { %s184_s4 = scalar_lea.sflag (!%p178_p3), [#allocation3], %s183_s28  ;;  %s187_s8 = scalar_lea.vmem (!%p178_p3), [#allocation2], %s635_s29 }
  0x32   : > { %835 = dma.done.wait (%p931_p7), %s184_s4, 512  }
  0x33   : > { %837 = vsyncadd (%p931_p7), %s184_s4, 4294966784  ;;  %vm242_vm0 = vcmask 130048   ;;  %v236_v0 = vld [vmem:[%s1043_s1] sm:$0xff]  ;;  %v237_v1 = vld [vmem:[%s1043_s1 + $0x8] sm:$0xff]  ;;  %v865_v7 = vmov 0.0|0.0   ;;  %vm866_vm1 = vmmov 0  }
  0x34   : > { %v238_v2 = vld [vmem:[%s187_s8] sm:$0xff]  ;;  %v707_v3 = vpack.c.bf16 %v237_v1, %v236_v0  ;;  %v240_v4 = vld [vmem:[%s187_s8 + $0x10] sm:$0xff]  ;;  %v239_v5 = vld [vmem:[%s187_s8 + $0x8] sm:$0xff]  ;;  %v867_v8 = vmov 0.0   ;;  %s636_s20 = sshll.u32 %s852_s15, 1  ;;  %vm429_vm2 = vcmask 138240  }
  0x35   : > { %675 = vmatprep.mubr.msk.f32.mxu0 %vm242_vm0, %v238_v2  ;;  %678 = vmatprep.mubr.msk.f32.mxu1 %vm242_vm0, %v240_v4  ;;  %v241_v6 = vld [vmem:[%s187_s8 + $0x18] sm:$0xff]  ;;  %v233_v15 = vld [vmem:[%s1042_s0] sm:$0xff]  ;;  %v234_v16 = vld [vmem:[%s1042_s0 + $0x8] sm:$0xff]  ;;  %p224_p7 = scmp.lt.s32.totalorder %s636_s20, 7  ;;  %vm432_vm3 = vcmask 132096  }
  0x36   : > { %708 = vmatprep.subr.bf16.mxu0 %v707_v3  ;;  %717 = vmatprep.subr.bf16.mxu1 %v707_v3  ;;  %v235_v17 = vld [vmem:[%s1042_s0 + $0x10] sm:$0x3] }
  0x37   : > { %710 = vmatpush3.bf16.msra.mxu0 %v707_v3  ;;  %718 = vmatpush3.bf16.msra.mxu1 %v707_v3  ;;  %s1057_s20 = smov (!%p224_p7, %s636_s20), 7 }
  0x38   : > { %711 = vmatprep.subr.bf16.mxu1 %v865_v7  ;;  %714 = vmatprep.subr.bf16.mxu0 %v865_v7  ;;  %s719_s21 = smul.u32 24, %s1057_s20 }
  0x3a   : > { %676 = vmatmul.mubr.msk.f32.vlgmr.msra.gmra.mrb[0].mxu0 %vm242_vm0, %v239_v5  ;;  %679 = vmatmul.mubr.msk.f32.vlgmr.msra.gmra.mrb[0].mxu1 %vm242_vm0, %v241_v6  ;;  %s231_s26 = scalar_lea.vmem %s1045_s3, %s719_s21 }
  0x3b   : > { %685 = vmatprep.mubr.msk.f32.mxu1 %vm866_vm1, %v867_v8  ;;  %698 = vmatprep.mubr.msk.f32.mxu0 %vm866_vm1, %v867_v8 }
 0x10d   : > { %v677_v9 = vpop.f32.mrb[0].mxu0  ;;  %v680_v10 = vpop.f32.mrb[0].mxu1 }
 0x10e   : > { %v321_v11 = vpop.f32.mrb[1].mxu0  ;;  %v331_v12 = vpop.f32.mrb[1].mxu1 }
 0x10f   : > { %v712_v13 = vpack.c.bf16 %v677_v9, %v321_v11  ;;  %v715_v14 = vpack.c.bf16 %v680_v10, %v331_v12 }
 0x111   : > { %713 = vmatpush3.bf16.msra.mxu1 %v712_v13  ;;  %716 = vmatpush3.bf16.msra.mxu0 %v715_v14 }
 0x114   : > { %686 = vmatmul.mubr.msk.f32.vlgmr.msra.gmra.mrb[2].mxu1 %vm242_vm0, %v233_v15  ;;  %699 = vmatmul.mubr.msk.f32.vlgmr.msra.gmra.mrb[2].mxu0 %vm242_vm0, %v233_v15 }
 0x115   : > { %688 = vmatprep.mubr.msk.f32.mxu1 %vm866_vm1, %v867_v8  ;;  %701 = vmatprep.mubr.msk.f32.mxu0 %vm866_vm1, %v867_v8 }
 0x118   : > { %689 = vmatmul.mubr.msk.f32.gmra.mrb[4].mxu1 %vm242_vm0, %v234_v16  ;;  %702 = vmatmul.mubr.msk.f32.gmra.mrb[4].mxu0 %vm242_vm0, %v234_v16 }
 0x119   : > { %691 = vmatprep.mubr.msk.f32.mxu1 %vm866_vm1, %v867_v8  ;;  %704 = vmatprep.mubr.msk.f32.mxu0 %vm866_vm1, %v867_v8 }
 0x11c   : > { %692 = vmatmul.mubr.msk.f32.gmra.mrb[6].mxu1 %vm242_vm0, %v235_v17  ;;  %705 = vmatmul.mubr.msk.f32.gmra.mrb[6].mxu0 %vm242_vm0, %v235_v17 }
 0x1e7   : > { %v415_v18 = vpop.f32.mrb[2].mxu1  ;;  %v500_v19 = vpop.f32.mrb[2].mxu0 }
 0x1e8   : > { %430 = vst.msk [vmem:[%s231_s26] sm:$0xff] %vm429_vm2, %v415_v18  ;;  %v687_v20 = vpop.f32.mrb[3].mxu1  ;;  %v700_v21 = vpop.f32.mrb[3].mxu0  ;;  %648 = vst.msk [vmem:[%s231_s26 + $0x18] sm:$0xff] %vm429_vm2, %v500_v19 }
 0x1eb   : > { %v420_v22 = vpop.f32.mrb[4].mxu1  ;;  %v505_v23 = vpop.f32.mrb[4].mxu0 }
 0x1ec   : > { %431 = vst.msk [vmem:[%s231_s26 + $0x8] sm:$0xff] %vm429_vm2, %v420_v22  ;;  %v690_v24 = vpop.f32.mrb[5].mxu1  ;;  %v703_v25 = vpop.f32.mrb[5].mxu0  ;;  %649 = vst.msk [vmem:[%s231_s26 + $0x20] sm:$0xff] %vm429_vm2, %v505_v23 }
 0x1ef   : > { %v425_v26 = vpop.f32.mrb[6].mxu1  ;;  %v510_v27 = vpop.f32.mrb[6].mxu0 }
 0x1f0   : > { %433 = vst.msk [vmem:[%s231_s26 + $0x10] sm:$0x3] %vm432_vm3, %v425_v26  ;;  %v693_v28 = vpop.f32.mrb[7].mxu1  ;;  %v706_v29 = vpop.f32.mrb[7].mxu0  ;;  %650 = vst.msk [vmem:[%s231_s26 + $0x28] sm:$0x3] %vm432_vm3, %v510_v27 }
 0x1f1 PF: > { %s16_s17 = sadd.s32 1, %s860_s17   ;;  %s1049_s12 = smov %s844_s13 }
 0x1f2   : > { %p13_p9 = scmp.ge.s32.totalorder %s16_s17, 6   ;;  %s1050_s13 = smov %s848_s14 }
 0x1f3   : > { %s1051_s14 = smov %s937_s24  ;;  %s1052_s15 = smov %s856_s16 }
 0x1f4   : > { %s1053_s16 = smov %s1055_s19  ;;  %15 = sbr.rel (!%p13_p9) target bundleno = 4 (0x4), region = 76 }
 0x1fb   :  { %548 = vsyncpa [#allocation3], 1 }
 0x1fc   :  { %550 = vsyncpa [#allocation3 + $0x1], 1 }

</bundles_post_ra>
